<compile_context>
chip_gen: v7x
topology: tpu7x:2x2x1
jax: 0.10.0
libtpu: 0.0.40
codegen_flags: <defaults>
</compile_context>

<pallas_src>
import functools

import jax
import jax.numpy as jnp
import numpy as np
from jax.experimental import pallas as pl
from jax.experimental.pallas import tpu as pltpu


def _vmem_limit_bytes():
    """Generation-aware scoped-VMEM limit (v5e/v6e: 128 MiB physical, v7x: 64 MiB)."""
    try:
        cap = int(pltpu.get_tpu_info().vmem_capacity_bytes)
    except Exception:
        cap = 64 * 1024 * 1024
    return max(16 * 1024 * 1024, min(int(cap * 0.6), 96 * 1024 * 1024))


# -----------------------------------------------------------------------------
# Single fused CRU kernel (one grid step == one sample).
#   big = [x shifted by the 9 (dy,dx) taps]        (9C, HW)   sublane concat
#   Y1  = W1 @ big + b    (folded squeeze1 + GWC + PWC1)
#   Y2  = W2 @ x          (folded squeeze2 + PWC2 + identity)
#   out = Y1*softmax(pool)[:C] + Y2*softmax(pool)[C:]
# -----------------------------------------------------------------------------
def _cru_kernel(x_ref, w1_ref, b1_ref, w2_ref, o_ref, xpad_ref, *, H, W):
    # x_ref   : (1, C, H*W)        channels on sublanes, flattened spatial on lanes
    # w1_ref  : (C, 9*C)           folded tap weights (tap k -> cols [kC:(k+1)C])
    # b1_ref  : (C, 1)             GWC bias
    # w2_ref  : (C, C)             folded low-branch weights
    # o_ref   : (1, C, H*W)
    # xpad_ref: (C, H*W + 2W + 2)  VMEM scratch: flat zero-padded copy of x
    HW = H * W
    L = W + 1                       # flat left halo (covers dy=-1, dx=-1)

    x = x_ref[0]                    # (C, HW)

    # In-kernel halo padding (no HBM pad pass): every 3x3 tap becomes a static
    # lane-offset slice of the padded scratch.
    xpad_ref[...] = jnp.zeros_like(xpad_ref)
    xpad_ref[:, L:L + HW] = x

    # dx = +-1 taps bleed across row boundaries in the flat layout -> mask those
    # output columns; dy out-of-range reads land in the zero halo already.
    col = jax.lax.broadcasted_iota(jnp.int32, (1, HW), 1) % W
    ok_l = col > 0                  # valid positions for dx = -1
    ok_r = col < (W - 1)            # valid positions for dx = +1

    taps = []
    for dy in (-1, 0, 1):
        for dx in (-1, 0, 1):
            off = L + dy * W + dx
            t = xpad_ref[:, off:off + HW]                       # (C, HW)
            if dx == -1:
                t = jnp.where(ok_l, t, jnp.zeros_like(t))
            elif dx == 1:
                t = jnp.where(ok_r, t, jnp.zeros_like(t))
            taps.append(t)
    big = jnp.concatenate(taps, axis=0)                         # (9C, HW)

    y1 = jnp.dot(w1_ref[...], big,
                 preferred_element_type=jnp.float32) + b1_ref[...]   # (C, HW) f32
    y2 = jnp.dot(w2_ref[...], x,
                 preferred_element_type=jnp.float32)                  # (C, HW) f32

    # Tail: adaptive-avg-pool(1) -> joint softmax over 2C channels -> split-sum.
    inv_hw = 1.0 / float(HW)
    p1 = jnp.sum(y1, axis=1, keepdims=True) * inv_hw             # (C, 1)
    p2 = jnp.sum(y2, axis=1, keepdims=True) * inv_hw
    m = jnp.maximum(jnp.max(p1, axis=0, keepdims=True),
                    jnp.max(p2, axis=0, keepdims=True))          # (1, 1)
    e1 = jnp.exp(p1 - m)
    e2 = jnp.exp(p2 - m)
    denom = (jnp.sum(e1, axis=0, keepdims=True)
             + jnp.sum(e2, axis=0, keepdims=True))               # (1, 1)
    sm1 = e1 / denom
    sm2 = e2 / denom

    o_ref[0] = (y1 * sm1 + y2 * sm2).astype(o_ref.dtype)


def cru_forward(x_nchw, params, *, matmul_dtype=jnp.float32):
    """Pallas-backed CRU forward: (N, C, H, W) f32 -> (N, C, H, W) f32.

    matmul_dtype=jnp.bfloat16 halves activation/weight bytes on the DMA-bound
    path (recommended on v6e/v7x; relax the verification tolerance to ~1e-2).
    """
    N, C, H, W = x_nchw.shape
    HW = H * W
    x_flat = x_nchw.reshape(N, C, HW).astype(matmul_dtype)   # free in HBM; NO transpose
    w1 = params["w1"].astype(matmul_dtype)
    w2 = params["w2"].astype(matmul_dtype)
    b1 = params["b1"]                                         # (C, 1), stays f32

    out = pl.pallas_call(
        functools.partial(_cru_kernel, H=H, W=W),
        out_shape=jax.ShapeDtypeStruct((N, C, HW), jnp.float32),
        grid=(N,),
        in_specs=[
            pl.BlockSpec((1, C, HW), lambda n: (n, 0, 0)),
            pl.BlockSpec((C, 9 * C), lambda n: (0, 0)),
            pl.BlockSpec((C, 1), lambda n: (0, 0)),
            pl.BlockSpec((C, C), lambda n: (0, 0)),
        ],
        out_specs=pl.BlockSpec((1, C, HW), lambda n: (n, 0, 0)),
        scratch_shapes=[pltpu.VMEM((C, HW + 2 * W + 2), matmul_dtype)],
        compiler_params=pltpu.CompilerParams(
            dimension_semantics=("parallel",),
            vmem_limit_bytes=_vmem_limit_bytes()),
    )(x_flat, w1, b1, w2)
    return out.reshape(N, C, H, W)


# -----------------------------------------------------------------------------
# Parameters (deterministic synthetic) + exact linear folding for the kernel.
# -----------------------------------------------------------------------------
def init_params(key, op_channel, alpha=0.5, squeeze_radio=2, group_size=2):
    hp = jax.lax.Precision.HIGHEST
    up_ch = int(alpha * op_channel)
    low_ch = op_channel - up_ch
    usq = up_ch // squeeze_radio
    lsq = low_ch // squeeze_radio
    ks = iter(jax.random.split(key, 16))

    def winit(shape, fan_in):
        return jax.random.normal(next(ks), shape, jnp.float32) / jnp.sqrt(float(fan_in))

    # Raw reference weights, (out, in) orientation like PyTorch conv weights.
    s1 = winit((usq, up_ch), up_ch)                         # squeeze1 1x1, no bias
    s2 = winit((lsq, low_ch), low_ch)                       # squeeze2 1x1, no bias
    gin, gout = usq // group_size, op_channel // group_size
    gwc = jnp.zeros((3, 3, op_channel, usq), jnp.float32)   # grouped 3x3 as dense block-diag
    for g in range(group_size):
        blk = winit((3, 3, gout, gin), 9 * gin)
        gwc = gwc.at[:, :, g * gout:(g + 1) * gout, g * gin:(g + 1) * gin].set(blk)
    gwc_b = 0.1 * jax.random.normal(next(ks), (op_channel,), jnp.float32)
    p1 = winit((op_channel, usq), usq)                      # PWC1 1x1, no bias
    p2 = winit((op_channel - lsq, lsq), lsq)                # PWC2 1x1, no bias

    mm = lambda a, b: jnp.einsum("oi,ic->oc", a, b, precision=hp)

    # Fold squeeze1 + GWC + PWC1 -> w1 (C, 9C); only the "up" input columns are used.
    w1_taps = []
    for kh in range(3):
        for kw in range(3):
            m = mm(gwc[kh, kw], s1)                         # (C, up_ch)
            if kh == 1 and kw == 1:
                m = m + mm(p1, s1)                          # PWC1 folded into center tap
            w1_taps.append(jnp.zeros((op_channel, op_channel),
                                     jnp.float32).at[:, :up_ch].set(m))
    w1 = jnp.concatenate(w1_taps, axis=1)                   # (C, 9C)

    # Fold squeeze2 + PWC2 + identity -> w2 (C, C); only the "low" input columns used.
    w2_low = jnp.concatenate([mm(p2, s2), s2], axis=0)      # (C, low_ch)
    w2 = jnp.zeros((op_channel, op_channel), jnp.float32).at[:, up_ch:].set(w2_low)

    return {"s1": s1, "s2": s2, "gwc": gwc, "gwc_b": gwc_b, "p1": p1, "p2": p2,
            "w1": w1, "b1": gwc_b.reshape(op_channel, 1), "w2": w2}


# -----------------------------------------------------------------------------
# Pure-JAX reference (same math as the PyTorch CRU), for verification.
# -----------------------------------------------------------------------------
def cru_reference(x, params, *, alpha=0.5, squeeze_radio=2):
    hp = jax.lax.Precision.HIGHEST
    N, C, H, W = x.shape
    up_ch = int(alpha * C)
    up, low = x[:, :up_ch], x[:, up_ch:]
    up_s = jnp.einsum("oc,nchw->nohw", params["s1"], up, precision=hp)
    low_s = jnp.einsum("oc,nchw->nohw", params["s2"], low, precision=hp)
    w_oihw = jnp.transpose(params["gwc"], (2, 3, 0, 1))       # (C, usq, 3, 3)
    gwc = jax.lax.conv_general_dilated(
        up_s, w_oihw, (1, 1), "SAME",
        dimension_numbers=("NCHW", "OIHW", "NCHW"),
        precision=hp) + params["gwc_b"][None, :, None, None]
    y1 = gwc + jnp.einsum("oc,nchw->nohw", params["p1"], up_s, precision=hp)
    y2 = jnp.concatenate(
        [jnp.einsum("oc,nchw->nohw", params["p2"], low_s, precision=hp), low_s], axis=1)
    out = jnp.concatenate([y1, y2], axis=1)
    pooled = jnp.mean(out, axis=(2, 3), keepdims=True)
    out = out * jax.nn.softmax(pooled, axis=1)
    return out[:, :C] + out[:, C:]


# -----------------------------------------------------------------------------
if __name__ == "__main__":
    key = jax.random.PRNGKey(0)
    k_x, k_p = jax.random.split(key)

    # op_channel=16 so the grouped 3x3 conv (groups=2) has valid per-group channels.
    N, C, H, W = 2, 16, 16, 16
    x_nchw = jax.random.normal(k_x, (N, C, H, W), jnp.float32)
    params = init_params(k_p, C)

    out = jax.block_until_ready(cru_forward(x_nchw, params))
    assert out.shape == (N, C, H, W), out.shape

    ref = cru_reference(x_nchw, params)
    np.testing.assert_allclose(np.asarray(out), np.asarray(ref),
                               rtol=5e-4, atol=5e-4)
    print("KERNEL_OK")
</pallas_src>

<mosaic_0001>
module attributes {stable_mosaic.version = 11 : i64} {
  func.func @_cru_kernel(%arg0: i32, %arg1: memref<1x16x256xf32, #tpu.memory_space<vmem>>, %arg2: memref<16x144xf32, #tpu.memory_space<vmem>>, %arg3: memref<16x1xf32, #tpu.memory_space<vmem>>, %arg4: memref<16x16xf32, #tpu.memory_space<vmem>>, %arg5: memref<1x16x256xf32, #tpu.memory_space<vmem>>, %arg6: memref<16x290xf32, #tpu.memory_space<vmem>>) attributes {dimension_semantics = [#tpu.dimension_semantics<parallel>], iteration_bounds = array<i64: 2>, scalar_prefetch = 0 : i64, scratch_operands = 1 : i64, tpu.core_type = #tpu.core_type<tc>, window_params = [{transform_indices = @transform_0, window_bounds = array<i64: 1, 16, 256>}, {pipeline_mode = #tpu.pipeline_mode<synchronous>, transform_indices = @transform_1, window_bounds = array<i64: 16, 144>}, {pipeline_mode = #tpu.pipeline_mode<synchronous>, transform_indices = @transform_2, window_bounds = array<i64: 16, 1>}, {pipeline_mode = #tpu.pipeline_mode<synchronous>, transform_indices = @transform_3, window_bounds = array<i64: 16, 16>}, {transform_indices = @transform_4, window_bounds = array<i64: 1, 16, 256>}]} {
    %c0 = arith.constant 0 : index
    %c0_0 = arith.constant 0 : index
    %c0_1 = arith.constant 0 : index
    %0 = vector.load %arg1[%c0, %c0_0, %c0_1] : memref<1x16x256xf32, #tpu.memory_space<vmem>>, vector<1x16x256xf32>
    %1 = vector.shape_cast %0 : vector<1x16x256xf32> to vector<16x256xf32>
    %cst = arith.constant 0.000000e+00 : f32
    %2 = vector.broadcast %cst : f32 to vector<16x290xf32>
    %c0_2 = arith.constant 0 : index
    %c0_3 = arith.constant 0 : index
    %3 = vector.load %arg6[%c0_2, %c0_3] : memref<16x290xf32, #tpu.memory_space<vmem>>, vector<16x290xf32>
    tpu.vector_store %arg6[%c0_2, %c0_3], %2 {strides = array<i32>} : memref<16x290xf32, #tpu.memory_space<vmem>>, vector<16x290xf32>,
    %c0_4 = arith.constant 0 : index
    %c17 = arith.constant 17 : index
    %4 = vector.load %arg6[%c0_4, %c17] : memref<16x290xf32, #tpu.memory_space<vmem>>, vector<16x256xf32>
    tpu.vector_store %arg6[%c0_4, %c17], %1 {strides = array<i32>} : memref<16x290xf32, #tpu.memory_space<vmem>>, vector<16x256xf32>,
    %5 = tpu.iota {dimensions = array<i32: 1>} : vector<1x256xi32>
    %c16_i32 = arith.constant 16 : i32
    %c0_i32 = arith.constant 0 : i32
    %6 = arith.cmpi eq, %c16_i32, %c0_i32 : i32
    %c1_i32 = arith.constant 1 : i32
    %7 = arith.select %6, %c1_i32, %c16_i32 : i32
    %8 = vector.broadcast %7 : i32 to vector<1x256xi32>
    %9 = arith.remsi %5, %8 : vector<1x256xi32>
    %c0_i32_5 = arith.constant 0 : i32
    %10 = vector.broadcast %c0_i32_5 : i32 to vector<1x256xi32>
    %11 = arith.cmpi ne, %9, %10 : vector<1x256xi32>
    %c0_i32_6 = arith.constant 0 : i32
    %12 = vector.broadcast %c0_i32_6 : i32 to vector<1x256xi32>
    %13 = arith.cmpi slt, %9, %12 : vector<1x256xi32>
    %c0_i32_7 = arith.constant 0 : i32
    %14 = arith.cmpi slt, %7, %c0_i32_7 : i32
    %15 = vector.broadcast %14 : i1 to vector<1x256xi1>
    %16 = vector.broadcast %15 : vector<1x256xi1> to vector<1x256xi1>
    %17 = arith.xori %13, %16 : vector<1x256xi1>
    %18 = arith.andi %17, %11 : vector<1x256xi1>
    %19 = vector.broadcast %7 : i32 to vector<1x256xi32>
    %20 = arith.addi %9, %19 : vector<1x256xi32>
    %21 = arith.select %18, %20, %9 : vector<1x256xi1>, vector<1x256xi32>
    %c0_i32_8 = arith.constant 0 : i32
    %22 = vector.broadcast %c0_i32_8 : i32 to vector<1x256xi32>
    %23 = arith.cmpi sgt, %21, %22 : vector<1x256xi32>
    %c15_i32 = arith.constant 15 : i32
    %24 = vector.broadcast %c15_i32 : i32 to vector<1x256xi32>
    %25 = arith.cmpi slt, %21, %24 : vector<1x256xi32>
    %c0_9 = arith.constant 0 : index
    %c0_10 = arith.constant 0 : index
    %26 = vector.load %arg6[%c0_9, %c0_10] : memref<16x290xf32, #tpu.memory_space<vmem>>, vector<16x256xf32>
    %cst_11 = arith.constant 0.000000e+00 : f32
    %27 = vector.broadcast %cst_11 : f32 to vector<16x256xf32>
    %28 = vector.shape_cast %23 : vector<1x256xi1> to vector<1x256xi1>
    %29 = vector.broadcast %28 : vector<1x256xi1> to vector<16x256xi1>
    %30 = arith.select %29, %26, %27 : vector<16x256xi1>, vector<16x256xf32>
    %c0_12 = arith.constant 0 : index
    %c1 = arith.constant 1 : index
    %31 = vector.load %arg6[%c0_12, %c1] : memref<16x290xf32, #tpu.memory_space<vmem>>, vector<16x256xf32>
    %c0_13 = arith.constant 0 : index
    %c2 = arith.constant 2 : index
    %32 = vector.load %arg6[%c0_13, %c2] : memref<16x290xf32, #tpu.memory_space<vmem>>, vector<16x256xf32>
    %cst_14 = arith.constant 0.000000e+00 : f32
    %33 = vector.broadcast %cst_14 : f32 to vector<16x256xf32>
    %34 = vector.shape_cast %25 : vector<1x256xi1> to vector<1x256xi1>
    %35 = vector.broadcast %34 : vector<1x256xi1> to vector<16x256xi1>
    %36 = arith.select %35, %32, %33 : vector<16x256xi1>, vector<16x256xf32>
    %c0_15 = arith.constant 0 : index
    %c16 = arith.constant 16 : index
    %37 = vector.load %arg6[%c0_15, %c16] : memref<16x290xf32, #tpu.memory_space<vmem>>, vector<16x256xf32>
    %cst_16 = arith.constant 0.000000e+00 : f32
    %38 = vector.broadcast %cst_16 : f32 to vector<16x256xf32>
    %39 = vector.shape_cast %23 : vector<1x256xi1> to vector<1x256xi1>
    %40 = vector.broadcast %39 : vector<1x256xi1> to vector<16x256xi1>
    %41 = arith.select %40, %37, %38 : vector<16x256xi1>, vector<16x256xf32>
    %c0_17 = arith.constant 0 : index
    %c17_18 = arith.constant 17 : index
    %42 = vector.load %arg6[%c0_17, %c17_18] : memref<16x290xf32, #tpu.memory_space<vmem>>, vector<16x256xf32>
    %c0_19 = arith.constant 0 : index
    %c18 = arith.constant 18 : index
    %43 = vector.load %arg6[%c0_19, %c18] : memref<16x290xf32, #tpu.memory_space<vmem>>, vector<16x256xf32>
    %cst_20 = arith.constant 0.000000e+00 : f32
    %44 = vector.broadcast %cst_20 : f32 to vector<16x256xf32>
    %45 = vector.shape_cast %25 : vector<1x256xi1> to vector<1x256xi1>
    %46 = vector.broadcast %45 : vector<1x256xi1> to vector<16x256xi1>
    %47 = arith.select %46, %43, %44 : vector<16x256xi1>, vector<16x256xf32>
    %c0_21 = arith.constant 0 : index
    %c32 = arith.constant 32 : index
    %48 = vector.load %arg6[%c0_21, %c32] : memref<16x290xf32, #tpu.memory_space<vmem>>, vector<16x256xf32>
    %cst_22 = arith.constant 0.000000e+00 : f32
    %49 = vector.broadcast %cst_22 : f32 to vector<16x256xf32>
    %50 = vector.shape_cast %23 : vector<1x256xi1> to vector<1x256xi1>
    %51 = vector.broadcast %50 : vector<1x256xi1> to vector<16x256xi1>
    %52 = arith.select %51, %48, %49 : vector<16x256xi1>, vector<16x256xf32>
    %c0_23 = arith.constant 0 : index
    %c33 = arith.constant 33 : index
    %53 = vector.load %arg6[%c0_23, %c33] : memref<16x290xf32, #tpu.memory_space<vmem>>, vector<16x256xf32>
    %c0_24 = arith.constant 0 : index
    %c34 = arith.constant 34 : index
    %54 = vector.load %arg6[%c0_24, %c34] : memref<16x290xf32, #tpu.memory_space<vmem>>, vector<16x256xf32>
    %cst_25 = arith.constant 0.000000e+00 : f32
    %55 = vector.broadcast %cst_25 : f32 to vector<16x256xf32>
    %56 = vector.shape_cast %25 : vector<1x256xi1> to vector<1x256xi1>
    %57 = vector.broadcast %56 : vector<1x256xi1> to vector<16x256xi1>
    %58 = arith.select %57, %54, %55 : vector<16x256xi1>, vector<16x256xf32>
    %59 = tpu.concatenate %30, %31, %36, %41, %42, %47, %52, %53, %58 in 0 : vector<16x256xf32>, vector<16x256xf32>, vector<16x256xf32>, vector<16x256xf32>, vector<16x256xf32>, vector<16x256xf32>, vector<16x256xf32>, vector<16x256xf32>, vector<16x256xf32> -> vector<144x256xf32>
    %c0_26 = arith.constant 0 : index
    %c0_27 = arith.constant 0 : index
    %60 = vector.load %arg2[%c0_26, %c0_27] : memref<16x144xf32, #tpu.memory_space<vmem>>, vector<16x144xf32>
    %cst_28 = arith.constant dense<0.000000e+00> : vector<16x256xf32>
    %61 = tpu.matmul %60, %59, %cst_28 {dimension_numbers = #tpu.dot_dimension_numbers<[1], [0], [0], [1], [0, 0, 1, 1], [], []>} : vector<16x144xf32>, vector<144x256xf32>, vector<16x256xf32> -> vector<16x256xf32>
    %c0_29 = arith.constant 0 : index
    %c0_30 = arith.constant 0 : index
    %62 = vector.load %arg3[%c0_29, %c0_30] : memref<16x1xf32, #tpu.memory_space<vmem>>, vector<16x1xf32>
    %63 = vector.broadcast %62 : vector<16x1xf32> to vector<16x256xf32>
    %64 = arith.addf %61, %63 : vector<16x256xf32>
    %c0_31 = arith.constant 0 : index
    %c0_32 = arith.constant 0 : index
    %65 = vector.load %arg4[%c0_31, %c0_32] : memref<16x16xf32, #tpu.memory_space<vmem>>, vector<16x16xf32>
    %cst_33 = arith.constant dense<0.000000e+00> : vector<16x256xf32>
    %66 = tpu.matmul %65, %1, %cst_33 {dimension_numbers = #tpu.dot_dimension_numbers<[1], [0], [0], [1], [0, 0, 1, 1], [], []>} : vector<16x16xf32>, vector<16x256xf32>, vector<16x256xf32> -> vector<16x256xf32>
    %cst_34 = arith.constant dense<0.000000e+00> : vector<16xf32>
    %67 = vector.multi_reduction <add>, %64, %cst_34 [1] : vector<16x256xf32> to vector<16xf32>
    %68 = vector.shape_cast %67 : vector<16xf32> to vector<16x1xf32>
    %cst_35 = arith.constant 3.906250e-03 : f32
    %69 = vector.broadcast %cst_35 : f32 to vector<16x1xf32>
    %70 = arith.mulf %68, %69 : vector<16x1xf32>
    %cst_36 = arith.constant dense<0.000000e+00> : vector<16xf32>
    %71 = vector.multi_reduction <add>, %66, %cst_36 [1] : vector<16x256xf32> to vector<16xf32>
    %72 = vector.shape_cast %71 : vector<16xf32> to vector<16x1xf32>
    %cst_37 = arith.constant 3.906250e-03 : f32
    %73 = vector.broadcast %cst_37 : f32 to vector<16x1xf32>
    %74 = arith.mulf %72, %73 : vector<16x1xf32>
    %cst_38 = arith.constant dense<0xFF800000> : vector<1xf32>
    %75 = vector.multi_reduction <maximumf>, %70, %cst_38 [0] : vector<16x1xf32> to vector<1xf32>
    %76 = vector.shape_cast %75 : vector<1xf32> to vector<1x1xf32>
    %cst_39 = arith.constant dense<0xFF800000> : vector<1xf32>
    %77 = vector.multi_reduction <maximumf>, %74, %cst_39 [0] : vector<16x1xf32> to vector<1xf32>
    %78 = vector.shape_cast %77 : vector<1xf32> to vector<1x1xf32>
    %79 = arith.maximumf %76, %78 : vector<1x1xf32>
    %80 = vector.broadcast %79 : vector<1x1xf32> to vector<16x1xf32>
    %81 = arith.subf %70, %80 : vector<16x1xf32>
    %82 = math.exp %81 : vector<16x1xf32>
    %83 = vector.broadcast %79 : vector<1x1xf32> to vector<16x1xf32>
    %84 = arith.subf %74, %83 : vector<16x1xf32>
    %85 = math.exp %84 : vector<16x1xf32>
    %cst_40 = arith.constant dense<0.000000e+00> : vector<1xf32>
    %86 = vector.multi_reduction <add>, %82, %cst_40 [0] : vector<16x1xf32> to vector<1xf32>
    %87 = vector.shape_cast %86 : vector<1xf32> to vector<1x1xf32>
    %cst_41 = arith.constant dense<0.000000e+00> : vector<1xf32>
    %88 = vector.multi_reduction <add>, %85, %cst_41 [0] : vector<16x1xf32> to vector<1xf32>
    %89 = vector.shape_cast %88 : vector<1xf32> to vector<1x1xf32>
    %90 = arith.addf %87, %89 : vector<1x1xf32>
    %91 = vector.broadcast %90 : vector<1x1xf32> to vector<16x1xf32>
    %92 = arith.divf %82, %91 : vector<16x1xf32>
    %93 = vector.broadcast %90 : vector<1x1xf32> to vector<16x1xf32>
    %94 = arith.divf %85, %93 : vector<16x1xf32>
    %95 = vector.broadcast %92 : vector<16x1xf32> to vector<16x256xf32>
    %96 = arith.mulf %64, %95 : vector<16x256xf32>
    %97 = vector.broadcast %94 : vector<16x1xf32> to vector<16x256xf32>
    %98 = arith.mulf %66, %97 : vector<16x256xf32>
    %99 = arith.addf %96, %98 : vector<16x256xf32>
    %c0_42 = arith.constant 0 : index
    %c0_43 = arith.constant 0 : index
    %c0_44 = arith.constant 0 : index
    %100 = vector.load %arg5[%c0_42, %c0_43, %c0_44] : memref<1x16x256xf32, #tpu.memory_space<vmem>>, vector<1x16x256xf32>
    %101 = vector.shape_cast %100 : vector<1x16x256xf32> to vector<16x256xf32>
    %102 = vector.shape_cast %99 : vector<16x256xf32> to vector<1x16x256xf32>
    tpu.vector_store %arg5[%c0_42, %c0_43, %c0_44], %102 {strides = array<i32>} : memref<1x16x256xf32, #tpu.memory_space<vmem>>, vector<1x16x256xf32>,
    return
  }
  func.func @transform_0(%arg0: i32) -> (i32, i32, i32) {
    %c0_i32 = arith.constant 0 : i32
    %c0_i32_0 = arith.constant 0 : i32
    %c0_i32_1 = arith.constant 0 : i32
    return %arg0, %c0_i32, %c0_i32_0 : i32, i32, i32
  }
  func.func @transform_1(%arg0: i32) -> (i32, i32) {
    %c0_i32 = arith.constant 0 : i32
    %c0_i32_0 = arith.constant 0 : i32
    %c0_i32_1 = arith.constant 0 : i32
    return %c0_i32, %c0_i32_0 : i32, i32
  }
  func.func @transform_2(%arg0: i32) -> (i32, i32) {
    %c0_i32 = arith.constant 0 : i32
    %c0_i32_0 = arith.constant 0 : i32
    %c0_i32_1 = arith.constant 0 : i32
    return %c0_i32, %c0_i32_0 : i32, i32
  }
  func.func @transform_3(%arg0: i32) -> (i32, i32) {
    %c0_i32 = arith.constant 0 : i32
    %c0_i32_0 = arith.constant 0 : i32
    %c0_i32_1 = arith.constant 0 : i32
    return %c0_i32, %c0_i32_0 : i32, i32
  }
  func.func @transform_4(%arg0: i32) -> (i32, i32, i32) {
    %c0_i32 = arith.constant 0 : i32
    %c0_i32_0 = arith.constant 0 : i32
    %c0_i32_1 = arith.constant 0 : i32
    return %arg0, %c0_i32, %c0_i32_0 : i32, i32, i32
  }
}

</mosaic_0001>

<bundles_post_ra>
// kernel: tpu_custom_call.1
= control target key start
LH: loop header
LB: loop body
LE: loop exit
PB: predicated region body
PF: predicated region fallthrough
CT: control target
= control target key end

     0   :  { %9 = vsyncpa [#allocation4], 0  ;;  %s1728_s0 = inlined_call_operand.hbm [shape: f32[2,16,256], index: 0, kind: input, shape index: {}]   ;;  %s1729_s1 = inlined_call_operand.hbm [shape: f32[16,144], index: 1, kind: input, shape index: {}]   ;;  %s1730_s2 = inlined_call_operand.vmem [shape: f32[16,1], index: 2, kind: input, shape index: {}]   ;;  %s1731_s3 = inlined_call_operand.vmem [shape: f32[16,16], index: 3, kind: input, shape index: {}]   ;;  %s1732_s4 = inlined_call_operand.hbm [shape: f32[2,16,256], index: 4, kind: output, shape index: {}]  }
   0x1   :  { %11 = vsyncpa [#allocation4 + $0x1], 0 }
   0x2   :  { %12 = vsyncpa [#allocation7], 0 }
   0x3   :  { %13 = vsyncpa [#allocation5], 0 }
   0x4   :  { %15 = vsyncpa [#allocation5 + $0x1], 0  ;;  %s1349_s15 = smov 0   ;;  %s1351_s16 = smov 0  }
   0x5   :  { %s1353_s17 = smov 0   ;;  %s1355_s18 = smov 0  }
   0x6 LB: > { %s1370_s19 = sadd.s32 4294967295, %s1304_s18   ;;  %s874_s20 = sadd.s32 4294967294, %s1304_s18   ;;  %s1304_s18 = sphi %s1355_s18, %s1762_s18   ;;  %s1300_s17 = sphi %s1353_s17, %s1761_s17   ;;  %s1296_s16 = sphi %s1351_s16, %s1760_s16   ;;  %s1292_s15 = sphi %s1349_s15, %s1759_s15  }
   0x7   : > { %p41_p0 = scmp.ne.s32.totalorder %s1296_s16, %s1292_s15  ;;  %p1733_p1 = scmp.eq.s32.totalorder %s1370_s19, 0 }
   0x8   : > { %p134_p3 = scmp.eq.s32.totalorder %s874_s20, 1  ;;  %p875_p5 = scmp.ge.s32.totalorder %s1304_s18, 1 }
   0x9   : > { %p1379_p4 = por %p1733_p1, %p41_p0  ;;  %p141_p7 = scmp.lt.s32.totalorder %s1304_s18, 3 }
   0xa   : > { %p1384_p6 = por %p134_p3, %p41_p0  ;;  %s1306_s24 = smov [#allocation6]  }
   0xb   : > { %s1736_s21 = scalar_select %p1379_p4, 1, 0 }
   0xc   : > { %s1737_s22 = scalar_select %p1384_p6, 1, 0 }
   0xd   : > { %p1389_p8 = pnand %p875_p5, %p141_p7  ;;  %s153_s25 = sshll.u32 %s1306_s24, 4  ;;  %s1393_s25 = int_to_ptr.vmem [resolvable:$true] %s153_s25 }
   0xe   : > { %s1405_s27 = sadd.s32 1, %s1304_s18   ;;  %s28_s28 = sadd.s32 1, %s1300_s17 }
   0xf   : > { %s1738_s23 = scalar_select %p1389_p8, 1, 0 }
  0x10   : > { %p980_p9 = pneg %p1389_p8  ;;  %s25_s29 = ssub.s32 %s1304_s18, %s1405_s27 }
  0x11   : > { %s1176_s6 = scalar_lea.hbm %s1729_s1, 512 }
  0x12   : > { %p1400_p11 = pnand %p980_p9, %p1733_p1  ;;  %p1177_p12 = scmp.ne.s32.totalorder %s1729_s1, %s1176_s6 }
  0x13   : > { %p1183_p5 = scmp.lt.u32.totalorder %s1176_s6, %s1729_s1 }
  0x14   : > { %p1178_p13 = pneg %p1400_p11 }
  0x16   : > { %p1179_p0 = pnand %p1178_p13, %p1177_p12 }
  0x18   : > { %p1180_p3 = pneg %p1179_p0 }
  0x1a   : > { %p1185_p7 = pnand %p1183_p5, %p1180_p3 }
  0x1c   : > { %1188 = shalt.err (!%p1185_p7)
}
  0x1d   : > { %s1189_s11 = scalar_lea.vmem %s1393_s25, 512  ;;  %p1197_p2 = scmp.lt.s32.totalorder %s1393_s25, %s1393_s25 }
  0x1e   : > { %p1190_p9 = scmp.ne.s32.totalorder %s1393_s25, %s1189_s11  ;;  %p1198_p6 = scmp.lt.s32.totalorder %s1189_s11, %s1189_s11 }
  0x20   : > { %p1192_p10 = pnand %p1190_p9, %p1178_p13  ;;  %p1199_p4 = por %p1198_p6, %p1197_p2 }
  0x22   : > { %p1193_p1 = pneg %p1192_p10 }
  0x24   : > { %p1200_p8 = pnand %p1199_p4, %p1193_p1 }
  0x26   : > { %1203 = shalt.err (!%p1200_p8)
}
  0x27   : > { %s1307_s12 = smov 256   ;;  %s1308_s13 = smov 16  }
  0x28   : > { %983 = dma.hbm_to_vmem [thread:$0]  (!%p1400_p11), %s1729_s1, 512, %s1393_s25, [#allocation7], %s1307_s12, %s1307_s12, %s1308_s13  }
  0x29   : > { %p26_p1 = scmp.eq.s32.totalorder %s25_s29, 0  ;;  %p35_p2 = scmp.ne.s32.totalorder %s1300_s17, %s1296_s16 }
  0x2a   : > { %p36_p4 = scmp.eq.s32.totalorder %s1304_s18, 0  ;;  %p993_p6 = scmp.lt.s32.totalorder %s1304_s18, 2 }
  0x2b   : > { %s1439_s24 = scalar_select %p26_p1, %s1300_s17, %s28_s28  }
  0x2c   : > { %p37_p8 = por %p36_p4, %p35_p2  ;;  %p1740_p10 = scmp.eq.s32.totalorder %s1370_s19, 1 }
  0x2d   : > { %s173_s26 = sand.u32 1, %s1300_s17   ;;  %s918_s5 = sshll.u32 %s1304_s18, 9 }
  0x2e   : > { %p1443_p12 = por %p1740_p10, %p35_p2  ;;  %s878_s6 = sshll.u32 %s173_s26, 5 }
  0x2f   : > { %s1452_s9 = scalar_lea.hbm %s1728_s0, %s918_s5  ;;  %s177_s25 = scalar_lea.vmem [#allocation3], %s878_s6 }
  0x30   : > { %s184_s28 = sshll.u32 %s177_s25, 4  ;;  %p1454_p11 = pnand %p993_p6, %p37_p8  ;;  %s1458_s28 = int_to_ptr.vmem [resolvable:$true] %s184_s28 }
  0x31   : > { %s1460_s10 = scalar_lea.sflag [#allocation4], %s173_s26  ;;  %s1204_s11 = scalar_lea.hbm %s1452_s9, 512 }
  0x32   : > { %p1205_p13 = scmp.ne.s32.totalorder %s1452_s9, %s1204_s11  ;;  %p1206_p0 = pneg %p1454_p11 }
  0x33   : > { %s1209_s5 = scalar_lea.hbm %s1728_s0, 1024  ;;  %p1210_p7 = scmp.lt.u32.totalorder %s1452_s9, %s1728_s0 }
  0x34   : > { %p1207_p3 = pnand %p1206_p0, %p1205_p13  ;;  %p1211_p9 = scmp.lt.u32.totalorder %s1209_s5, %s1204_s11 }
  0x35   : > { %p1213_p2 = scmp.lt.u32.totalorder %s1204_s11, %s1452_s9 }
  0x36   : > { %p1208_p5 = pneg %p1207_p3  ;;  %p1212_p1 = por %p1211_p9, %p1210_p7 }
  0x38   : > { %p1214_p4 = por %p1213_p2, %p1212_p1 }
  0x3a   : > { %p1215_p6 = pnand %p1214_p4, %p1208_p5 }
  0x3c   : > { %1218 = shalt.err (!%p1215_p6)
}
  0x3d   : > { %s1219_s26 = scalar_lea.vmem %s1458_s28, 512  ;;  %s1309_s8 = smov [#allocation3]  }
  0x3e   : > { %p1220_p8 = scmp.ne.s32.totalorder %s1458_s28, %s1219_s26  ;;  %s1224_s25 = sshll.u32 %s1309_s8, 4  ;;  %s1225_s25 = int_to_ptr.vmem [resolvable:$false] %s1224_s25 }
  0x3f   : > { %s1226_s14 = scalar_lea.vmem %s1225_s25, 1024  ;;  %p1227_p3 = scmp.lt.s32.totalorder %s1458_s28, %s1225_s25 }
  0x40   : > { %p1222_p10 = pnand %p1220_p8, %p1206_p0  ;;  %p1228_p7 = scmp.lt.s32.totalorder %s1226_s14, %s1219_s26 }
  0x42   : > { %p1223_p13 = pneg %p1222_p10  ;;  %p1229_p9 = por %p1228_p7, %p1227_p3 }
  0x44   : > { %p1230_p1 = pnand %p1229_p9, %p1223_p13 }
  0x46   : > { %1233 = shalt.err (!%p1230_p1)
}
  0x47   : > { %987 = dma.hbm_to_vmem [thread:$0]  (!%p1454_p11), %s1452_s9, 512, %s1458_s28, %s1460_s10, %s1307_s12, %s1307_s12, %s1308_s13  }
  0x48   : > { %p1743_p0 = scmp.ne.s32.totalorder %s1738_s23, 0 }
  0x49   : > { %s1494_s11 = sand.u32 (!%p1743_p0), 1, %s1296_s16   ;;  %p1744_p5 = scmp.ne.s32.totalorder (!%p1743_p0), %s1736_s21, 0 }
  0x4a   : > { %196 = sbr.rel (%p1743_p0) target bundleno = 832 (0x340), region = 36  ;;  %s882_s20 = sshll.u32 (!%p1743_p0), %s1494_s11, 5 }
  0x4b   : > { %s199_s5 = scalar_lea.sflag (!%p1743_p0), [#allocation4], %s1494_s11  ;;  %s202_s29 = scalar_lea.vmem (!%p1743_p0), [#allocation3], %s882_s20 }
  0x51   : > { %1279 = dma.done.wait (%p1744_p5), %s199_s5, 512  }
  0x52   : > { %1281 = vsyncadd (%p1744_p5), %s199_s5, 4294966784  ;;  %p1745_p11 = scmp.eq.s32.totalorder %s1370_s19, 0 }
  0x54   : > { %1283 = dma.done.wait (%p1745_p11), [#allocation7], 512   ;;  %p1746_p2 = pmov %p1745_p11 }
  0x55   : > { %vm237_vm0 = vcmask 277504   ;;  %v1310_v0 = vmov 0.0   ;;  %v1513_v1 = vld [vmem:[%s202_s29 + $0x10] sm:$0xff]  ;;  %v1515_v2 = vld [vmem:[%s202_s29] sm:$0xff]  ;;  %s1311_s21 = smov 17   ;;  %v1519_v3 = vld [vmem:[%s202_s29 + $0x18] sm:$0xff]  ;;  %v270_v5 = vlaneseq }
  0x56   : > { %1285 = vsyncadd (%p1746_p2), [#allocation7], 4294966784  ;;  %239 = vst [vmem:[#allocation2 + $0x18] sm:$0xff] %v1310_v0  ;;  %685 = vmatprep.mubr.f32.mxu1 %v1310_v0  ;;  %250 = vrot.lane.b32.xlu1 %v1513_v1, %s1311_s21  ;;  %v1521_v4 = vld [vmem:[%s202_s29 + $0x8] sm:$0xff]  ;;  %vm263_vm1 = vcmask 1047688   ;;  %vm254_vm2 = vcmask 138240   ;;  %v970_v29 = vpack.c.bf16 %v1513_v1, %v1515_v2 }
  0x57   : > { %235 = vst [vmem:[#allocation2] sm:$0xff] %v1310_v0  ;;  %241 = vst.msk [vmem:[#allocation2 + $0x28] sm:$0xff] %vm237_vm0, %v1310_v0  ;;  %246 = vrot.lane.b32.xlu0 %v1515_v2, %s1311_s21  ;;  %v1525_v6 = vand.u32 127, %v270_v5  ;;  %s1312_s23 = smov 126   ;;  %s1313_s12 = smov 127   ;;  %v514_v27 = vld [vmem:[#allocation6 + $0x8] sm:$0xff]  ;;  %v968_v28 = vpack.c.bf16 %v1519_v3, %v1521_v4 }
  0x58   : > { %238 = vst.msk [vmem:[#allocation2 + $0x10] sm:$0xff] %vm237_vm0, %v1310_v0  ;;  %s1314_s13 = smov 111   ;;  %s1315_s9 = smov 112   ;;  %vm529_vm7 = vcmask 130048   ;;  %v613_v30 = vld [vmem:[%s1731_s3] sm:$0xff]  ;;  %v1320_v31 = vmov 0  }
  0x59   : > { %v1528_v7 = vadd.s32 128, %v1525_v6  ;;  %v277_v11 = vand.u32 15, %v1525_v6  ;;  %s1316_s28 = smov 96   ;;  %s1317_s10 = smov 110   ;;  %909 = vmatprep.mubr.msk.f32.mxu0 %vm529_vm7, %v514_v27  ;;  %969 = vmatprep.subr.bf16.mxu1 %v968_v28  ;;  %v517_v32 = vld [vmem:[%s1730_s2] sm:$0xff]  ;;  %v518_v33 = vld [vmem:[%s1730_s2 + $0x8] sm:$0xff] }
  0x5a   : > { %252 = vrot.lane.b32.xlu1 %v1519_v3, %s1311_s21  ;;  %s1318_s6 = smov 95   ;;  %s1319_s7 = smov 94   ;;  %971 = vmatpush1.bf16.msra.mxu1 %v970_v29  ;;  %v614_v34 = vld [vmem:[%s1731_s3 + $0x8] sm:$0xff]  ;;  %vm462_vm8 = vcmask 1039360   ;;  %vm337_vm9 = vcmask 1031168   ;;  %vm362_vm12 = vcmask 916480  }
  0x5b   : > { %248 = vrot.lane.b32.xlu0 %v1521_v4, %s1311_s21  ;;  %v284_v8 = vand.u32 15, %v1528_v7  ;;  %vm297_vm5 = vcmp.gt.s32.totalorder %v277_v11, 0  ;;  %1165 = vset.pattern.permute.xlu1 %v1320_v31  ;;  %vm1580_vm11 = vcmp.lt.s32.totalorder %v277_v11, 15  ;;  %vm483_vm15 = vcmask 908288  }
  0x5c   : > { %vm1542_vm6 = vmpackc.low %vm297_vm5, %vm297_vm5  ;;  %1164 = vset.pattern.permute.xlu0 %v1320_v31  ;;  %vm387_vm0 = vcmask 900096  }
  0x5d   : > { %vm298_vm3 = vcmp.gt.s32.totalorder %v284_v8, 0  ;;  %911 = vmatmul.mubr.msk.f32.vlgmr.msra.gmra.mrb[0].mxu1 %vm529_vm7, %v613_v30  ;;  %vm300_vm10 = vcmp.lt.s32.totalorder %v284_v8, 15  ;;  %vm1595_vm14 = vmpackc.low %vm1580_vm11, %vm1580_vm11 }
  0x5e   : > { %vm1534_vm4 = vmpackc.low %vm298_vm3, %vm298_vm3  ;;  %691 = vmatprep.mubr.f32.mxu1 %v1310_v0  ;;  %vm437_vm3 = vcmask 769024  }
  0x5f   : > { %vm1588_vm13 = vmpackc.low %vm300_vm10, %vm300_vm10 }
  0x61   : > { %912 = vmatmul.mubr.msk.f32.gmra.mrb[2].mxu1 %vm529_vm7, %v614_v34 }
  0xc8   : > { %v251_v9 = vpop.permute.xlu1 %250 }
  0xc9   : > { %v247_v10 = vpop.permute.xlu0 %246  ;;  %267 = vst.msk [vmem:[#allocation2 + $0x18] sm:$0xff] %vm263_vm1, %v251_v9 }
  0xca   : > { %264 = vst.msk [vmem:[#allocation2] sm:$0xff] %vm263_vm1, %v247_v10  ;;  %vm412_vm1 = vcmask 785408  }
  0xcc   : > { %v253_v12 = vpop.permute.xlu1 %252 }
  0xcd   : > { %v249_v13 = vpop.permute.xlu0 %248  ;;  %v256_v14 = vsel %vm254_vm2, %v251_v9, %v253_v12  ;;  %269 = vst.msk [vmem:[#allocation2 + $0x28] sm:$0xff] %vm254_vm2, %v253_v12 }
  0xce   : > { %v255_v15 = vsel %vm254_vm2, %v247_v10, %v249_v13  ;;  %266 = vst.msk [vmem:[#allocation2 + $0x10] sm:$0xff] %vm254_vm2, %v249_v13  ;;  %vm504_vm2 = vcmask 777216  }
  0xcf   : > { %v920_v17 = vpack.c.bf16 %v256_v14, %v255_v15 }
  0xd0   : > { %v303_v19 = vld [vmem:[#allocation2 + $0x18] sm:$0xff] }
  0xd1   : > { %v301_v18 = vld [vmem:[#allocation2] sm:$0xff]  ;;  %922 = vmatprep.subr.msk.bf16.mxu0 %vm1534_vm4, %v920_v17 }
  0xd2   : > { %v1049_v20 = vpack.i.bf16 %v303_v19, %v301_v18  ;;  %v923_v22 = vpack.c.bf16 %v303_v19, %v301_v18 }
  0xd4   : > { %1050 = vrot.lane.b32.xlu1 %v1049_v20, %s1312_s23  ;;  %1045 = vrot.lane.b32.xlu0 %v1049_v20, %s1313_s12  ;;  %v314_v23 = vld [vmem:[#allocation2 + $0x28] sm:$0xff] }
  0xd5   : > { %925 = vmatpush1.bf16.msk.msra.mxu0 %vm1542_vm6, %v923_v22  ;;  %v1084_v24 = vpack.i.bf16 %v314_v23, %v256_v14  ;;  %v313_v25 = vld [vmem:[#allocation2 + $0x10] sm:$0xff] }
  0xd6   : > { %v1089_v26 = vpack.i.bf16 %v313_v25, %v255_v15 }
  0xd8   : > { %1060 = vrot.lane.b32.xlu1 %v1049_v20, %s1314_s13  ;;  %1055 = vrot.lane.b32.xlu0 %v1049_v20, %s1315_s9 }
  0xdc   : > { %1070 = vrot.lane.b32.xlu1 %v1049_v20, %s1316_s28  ;;  %1065 = vrot.lane.b32.xlu0 %v1049_v20, %s1317_s10 }
  0xe0   : > { %1085 = vrot.lane.b32.xlu1 %v1084_v24, %s1313_s12  ;;  %1075 = vrot.lane.b32.xlu0 %v1049_v20, %s1318_s6 }
  0xe4   : > { %1090 = vrot.lane.b32.xlu1 %v1089_v26, %s1312_s23  ;;  %1080 = vrot.lane.b32.xlu0 %v1089_v26, %s1313_s12  ;;  %s919_s12 = sshll.u32 %s1370_s19, 9 }
  0xe8   : > { %1105 = vrot.lane.b32.xlu1 %v1084_v24, %s1315_s9  ;;  %1095 = vrot.lane.b32.xlu0 %v1084_v24, %s1312_s23 }
  0xec   : > { %1110 = vrot.lane.b32.xlu1 %v1089_v26, %s1314_s13  ;;  %1100 = vrot.lane.b32.xlu0 %v1089_v26, %s1315_s9 }
  0xf0   : > { %1125 = vrot.lane.b32.xlu1 %v1084_v24, %s1317_s10  ;;  %1115 = vrot.lane.b32.xlu0 %v1084_v24, %s1314_s13  ;;  %s230_s13 = scalar_lea.vmem [#allocation8], %s882_s20 }
  0xf1   : > { %s791_s9 = sshll.u32 %s230_s13, 4  ;;  %s1684_s9 = int_to_ptr.vmem [resolvable:$true] %s791_s9 }
  0xf4   : > { %1130 = vrot.lane.b32.xlu1 %v1089_v26, %s1316_s28  ;;  %1120 = vrot.lane.b32.xlu0 %v1089_v26, %s1317_s10  ;;  %s778_s10 = scalar_lea.sflag [#allocation5], %s1494_s11 }
  0xf8   : > { %1145 = vrot.lane.b32.xlu1 %v1084_v24, %s1318_s6  ;;  %1135 = vrot.lane.b32.xlu0 %v1084_v24, %s1316_s28  ;;  %s1682_s28 = scalar_lea.hbm %s1732_s4, %s919_s12 }
  0xfc   : > { %1150 = vrot.lane.b32.xlu1 %v1089_v26, %s1319_s7  ;;  %1140 = vrot.lane.b32.xlu0 %v1089_v26, %s1318_s6  ;;  %s1234_s6 = scalar_lea.vmem %s1684_s9, 512 }
  0xfd   : > { %p1235_p4 = scmp.ne.s32.totalorder %s1684_s9, %s1234_s6 }
  0xff   : > { %p1236_p6 = pnand %p1235_p4, %p1443_p12 }
 0x100   : > { %1160 = vrot.lane.b32.xlu1 %v1049_v20, %s1319_s7  ;;  %1155 = vrot.lane.b32.xlu0 %v1084_v24, %s1319_s7  ;;  %s1321_s7 = smov [#allocation8]  }
 0x101   : > { %p1237_p8 = pneg %p1236_p6  ;;  %s1238_s26 = sshll.u32 %s1321_s7, 4  ;;  %s1239_s26 = int_to_ptr.vmem [resolvable:$false] %s1238_s26 }
 0x102   : > { %s1240_s8 = scalar_lea.vmem %s1239_s26, 1024  ;;  %p1241_p10 = scmp.lt.s32.totalorder %s1684_s9, %s1239_s26 }
 0x103   : > { %p1242_p13 = scmp.lt.s32.totalorder %s1240_s8, %s1234_s6 }
 0x104   : > { %521 = vperm.xlu0 %1164, %v517_v32   ;;  %526 = vperm.xlu1 %1165, %v518_v33  }
 0x105   : > { %p1243_p3 = por %p1242_p13, %p1241_p10 }
 0x107   : > { %p1244_p7 = pnand %p1243_p3, %p1237_p8 }
 0x146   : > { %v1051_v35 = vpop.permute.xlu1 %1050  ;;  %v1046_v36 = vpop.permute.xlu0 %1045 }
 0x147   : > { %v1048_v45 = vunpack.i.h.bf16 %v1046_v36  ;;  %v1047_v48 = vunpack.i.l.bf16 %v1046_v36  ;;  %v1053_v62 = vunpack.i.h.bf16 %v1051_v35  ;;  %v1052_v63 = vunpack.i.l.bf16 %v1051_v35 }
 0x14a   : > { %v1568_v37 = vpop.permute.xlu1 %1060  ;;  %v1056_v38 = vpop.permute.xlu0 %1055 }
 0x14b   : > { %v1058_v9 = vunpack.i.h.bf16 %v1056_v38  ;;  %v1057_v15 = vunpack.i.l.bf16 %v1056_v38  ;;  %v1063_v30 = vunpack.i.h.bf16 %v1568_v37  ;;  %v1062_v31 = vunpack.i.l.bf16 %v1568_v37 }
 0x14e   : > { %v1570_v39 = vpop.permute.xlu1 %1070  ;;  %v1572_v40 = vpop.permute.xlu0 %1065 }
 0x14f   : > { %v1072_v61 = vunpack.i.l.bf16 %v1570_v39 }
 0x152   : > { %v1086_v41 = vpop.permute.xlu1 %1085  ;;  %v1574_v42 = vpop.permute.xlu0 %1075 }
 0x153   : > { %v1088_v43 = vunpack.i.h.bf16 %v1086_v41  ;;  %v1087_v44 = vunpack.i.l.bf16 %v1086_v41 }
 0x155   : > { %v466_v51 = vsel %vm462_vm8, %v1087_v44, %v1088_v43  ;;  %v465_v52 = vsel %vm462_vm8, %v1048_v45, %v1087_v44  ;;  %v1068_v44 = vunpack.i.h.bf16 %v1572_v40 }
 0x156   : > { %v1091_v46 = vpop.permute.xlu1 %1090  ;;  %v1081_v47 = vpop.permute.xlu0 %1080 }
 0x157   : > { %v1083_v49 = vunpack.i.h.bf16 %v1081_v47  ;;  %v1082_v50 = vunpack.i.l.bf16 %v1081_v47  ;;  %v1093_v53 = vunpack.i.h.bf16 %v1091_v46  ;;  %v1092_v54 = vunpack.i.l.bf16 %v1091_v46 }
 0x159   : > { %v464_v55 = vsel %vm462_vm8, %v1082_v50, %v1083_v49  ;;  %v463_v56 = vsel %vm462_vm8, %v1047_v48, %v1082_v50  ;;  %v338_v4 = vsel %vm337_vm9, %v1052_v63, %v1092_v54  ;;  %v339_v5 = vsel %vm337_vm9, %v1092_v54, %v1093_v53 }
 0x15a   : > { %v1106_v57 = vpop.permute.xlu1 %1105  ;;  %v1096_v58 = vpop.permute.xlu0 %1095  ;;  %v926_v59 = vpack.c.bf16 %v466_v51, %v464_v55  ;;  %v928_v60 = vpack.c.bf16 %v465_v52, %v463_v56  ;;  %v1067_v48 = vunpack.i.l.bf16 %v1572_v40  ;;  %v1073_v40 = vunpack.i.h.bf16 %v1570_v39 }
 0x15b   : > { %v1098_v0 = vunpack.i.h.bf16 %v1096_v58  ;;  %v1097_v1 = vunpack.i.l.bf16 %v1096_v58  ;;  %v1108_v2 = vunpack.i.h.bf16 %v1106_v57  ;;  %v1107_v3 = vunpack.i.l.bf16 %v1106_v57 }
 0x15c   : > { %927 = vmatprep.subr.bf16.mxu0 %v926_v59  ;;  %v1078_v39 = vunpack.i.h.bf16 %v1574_v42 }
 0x15d   : > { %v340_v7 = vsel %vm337_vm9, %v1053_v62, %v1097_v1  ;;  %v341_v6 = vsel %vm337_vm9, %v1097_v1, %v1098_v0  ;;  %929 = vmatpush1.bf16.msra.mxu0 %v928_v60  ;;  %v365_v19 = vsel %vm362_vm12, %v1058_v9, %v1107_v3  ;;  %v366_v20 = vsel %vm362_vm12, %v1107_v3, %v1108_v2 }
 0x15e   : > { %v930_v10 = vpack.c.bf16 %v341_v6, %v339_v5  ;;  %v933_v11 = vpack.c.bf16 %v340_v7, %v338_v4  ;;  %v1111_v12 = vpop.permute.xlu1 %1110  ;;  %v1101_v13 = vpop.permute.xlu0 %1100 }
 0x15f   : > { %v1103_v17 = vunpack.i.h.bf16 %v1101_v13  ;;  %v1102_v18 = vunpack.i.l.bf16 %v1101_v13  ;;  %v1113_v22 = vunpack.i.h.bf16 %v1111_v12  ;;  %v1112_v23 = vunpack.i.l.bf16 %v1111_v12 }
 0x160   : > { %932 = vmatprep.subr.msk.bf16.mxu0 %vm1588_vm13, %v930_v10 }
 0x161   : > { %v363_v24 = vsel %vm362_vm12, %v1057_v15, %v1102_v18  ;;  %v364_v25 = vsel %vm362_vm12, %v1102_v18, %v1103_v17  ;;  %935 = vmatpush1.bf16.msk.msra.mxu0 %vm1595_vm14, %v933_v11  ;;  %v485_v36 = vsel %vm483_vm15, %v1112_v23, %v1113_v22  ;;  %v484_v41 = vsel %vm483_vm15, %v1062_v31, %v1112_v23 }
 0x162   : > { %v936_v26 = vpack.c.bf16 %v366_v20, %v364_v25  ;;  %v939_v27 = vpack.c.bf16 %v365_v19, %v363_v24  ;;  %v1126_v28 = vpop.permute.xlu1 %1125  ;;  %v1116_v29 = vpop.permute.xlu0 %1115  ;;  %v1077_v11 = vunpack.i.l.bf16 %v1574_v42 }
 0x163   : > { %v1118_v32 = vunpack.i.h.bf16 %v1116_v29  ;;  %v1117_v33 = vunpack.i.l.bf16 %v1116_v29  ;;  %v1128_v34 = vunpack.i.h.bf16 %v1126_v28  ;;  %v1127_v35 = vunpack.i.l.bf16 %v1126_v28 }
 0x164   : > { %938 = vmatprep.subr.msk.bf16.mxu0 %vm1534_vm4, %v936_v26 }
 0x165   : > { %941 = vmatpush1.bf16.msk.msra.mxu0 %vm1542_vm6, %v939_v27  ;;  %v487_v38 = vsel %vm483_vm15, %v1117_v33, %v1118_v32  ;;  %v486_v43 = vsel %vm483_vm15, %v1063_v30, %v1117_v33  ;;  %v390_v51 = vsel %vm387_vm0, %v1068_v44, %v1127_v35  ;;  %v391_v52 = vsel %vm387_vm0, %v1127_v35, %v1128_v34  ;;  %v513_v34 = vld [vmem:[#allocation6] sm:$0xff]  ;;  %v516_v35 = vld [vmem:[#allocation6 + $0x18] sm:$0xff] }
 0x166   : > { %v1131_v45 = vpop.permute.xlu1 %1130  ;;  %v1121_v46 = vpop.permute.xlu0 %1120  ;;  %v942_v37 = vpack.c.bf16 %v487_v38, %v485_v36  ;;  %v944_v47 = vpack.c.bf16 %v486_v43, %v484_v41  ;;  %v515_v36 = vld [vmem:[#allocation6 + $0x10] sm:$0xff] }
 0x167   : > { %v1123_v49 = vunpack.i.h.bf16 %v1121_v46  ;;  %v1122_v50 = vunpack.i.l.bf16 %v1121_v46  ;;  %v1133_v53 = vunpack.i.h.bf16 %v1131_v45  ;;  %v1132_v54 = vunpack.i.l.bf16 %v1131_v45  ;;  %v1644_v38 = vpop.f32.mrb[0].mxu1 }
 0x168   : > { %943 = vmatprep.subr.bf16.mxu0 %v942_v37  ;;  %v1646_v41 = vpop.f32.mrb[1].mxu1 }
 0x169   : > { %v388_v55 = vsel %vm387_vm0, %v1067_v48, %v1122_v50  ;;  %v389_v56 = vsel %vm387_vm0, %v1122_v50, %v1123_v49  ;;  %945 = vmatpush1.bf16.msra.mxu0 %v944_v47  ;;  %v413_v2 = vsel %vm412_vm1, %v1072_v61, %v1132_v54  ;;  %v414_v3 = vsel %vm412_vm1, %v1132_v54, %v1133_v53  ;;  %v1650_v44 = vpop.f32.mrb[2].mxu1 }
 0x16a   : > { %v946_v57 = vpack.c.bf16 %v391_v52, %v389_v56  ;;  %v949_v58 = vpack.c.bf16 %v390_v51, %v388_v55  ;;  %v1146_v59 = vpop.permute.xlu1 %1145  ;;  %v1136_v60 = vpop.permute.xlu0 %1135  ;;  %v706_v43 = vadd.f32 %v1646_v41, %v1644_v38 }
 0x16b   : > { %v1138_v62 = vunpack.i.h.bf16 %v1136_v60  ;;  %v1137_v63 = vunpack.i.l.bf16 %v1136_v60  ;;  %v1148_v0 = vunpack.i.h.bf16 %v1146_v59  ;;  %v1147_v1 = vunpack.i.l.bf16 %v1146_v59  ;;  %v1652_v8 = vpop.f32.mrb[3].mxu1 }
 0x16c   : > { %948 = vmatprep.subr.msk.bf16.mxu0 %vm1588_vm13, %v946_v57  ;;  %v709_v14 = vadd.f32 %v1652_v8, %v1650_v44 }
 0x16d   : > { %v415_v4 = vsel %vm412_vm1, %v1073_v40, %v1137_v63  ;;  %v416_v5 = vsel %vm412_vm1, %v1137_v63, %v1138_v62  ;;  %951 = vmatpush1.bf16.msk.msra.mxu0 %vm1595_vm14, %v949_v58  ;;  %v508_v15 = vsel %vm504_vm2, %v1147_v1, %v1148_v0  ;;  %v507_v17 = vsel %vm504_vm2, %v1078_v39, %v1147_v1 }
 0x16e   : > { %v952_v7 = vpack.c.bf16 %v416_v5, %v414_v3  ;;  %v955_v6 = vpack.c.bf16 %v415_v4, %v413_v2  ;;  %v1151_v9 = vpop.permute.xlu1 %1150  ;;  %v1141_v10 = vpop.permute.xlu0 %1140 }
 0x16f   : > { %v1143_v12 = vunpack.i.h.bf16 %v1141_v10  ;;  %v1142_v13 = vunpack.i.l.bf16 %v1141_v10  ;;  %v1153_v18 = vunpack.i.h.bf16 %v1151_v9  ;;  %v1152_v19 = vunpack.i.l.bf16 %v1151_v9 }
 0x170   : > { %954 = vmatprep.subr.msk.bf16.mxu0 %vm1534_vm4, %v952_v7 }
 0x171   : > { %957 = vmatpush1.bf16.msk.msra.mxu0 %vm1542_vm6, %v955_v6  ;;  %v506_v20 = vsel %vm504_vm2, %v1142_v13, %v1143_v12  ;;  %v505_v22 = vsel %vm504_vm2, %v1077_v11, %v1142_v13  ;;  %v439_v29 = vsel %vm437_vm3, %v1152_v19, %v1153_v18 }
 0x172   : > { %v1161_v42 = vpop.permute.xlu1 %1160  ;;  %v1156_v23 = vpop.permute.xlu0 %1155  ;;  %v958_v24 = vpack.c.bf16 %v508_v15, %v506_v20  ;;  %v960_v25 = vpack.c.bf16 %v507_v17, %v505_v22 }
 0x173   : > { %v1163_v16 = vunpack.i.h.bf16 %v1161_v42  ;;  %v1162_v26 = vunpack.i.l.bf16 %v1161_v42  ;;  %v1158_v27 = vunpack.i.h.bf16 %v1156_v23  ;;  %v1157_v28 = vunpack.i.l.bf16 %v1156_v23 }
 0x174   : > { %959 = vmatprep.subr.bf16.mxu0 %v958_v24 }
 0x175   : > { %v438_v30 = vsel %vm437_vm3, %v1162_v26, %v1152_v19  ;;  %v440_v31 = vsel %vm437_vm3, %v1163_v16, %v1157_v28  ;;  %v441_v32 = vsel %vm437_vm3, %v1157_v28, %v1158_v27  ;;  %961 = vmatpush1.bf16.msra.mxu0 %v960_v25 }
 0x176   : > { %v962_v21 = vpack.c.bf16 %v441_v32, %v439_v29  ;;  %v965_v33 = vpack.c.bf16 %v440_v31, %v438_v30 }
 0x178   : > { %964 = vmatprep.subr.msk.bf16.mxu0 %vm1588_vm13, %v962_v21 }
 0x179   : > { %967 = vmatpush1.bf16.msk.msra.mxu0 %vm1595_vm14, %v965_v33 }
 0x17c   : > { %601 = vmatmul.mubr.f32.vlgmr.msra.gmra.mrb[0].mxu0 %v513_v34 }
 0x17d   : > { %910 = vmatprep.mubr.msk.f32.mxu0 %vm529_vm7, %v516_v35 }
 0x180   : > { %607 = vmatmul.mubr.f32.gmra.mrb[2].mxu0 %v515_v36 }
 0x183   : > { %v522_v45 = vpop.permute.xlu0 %521  ;;  %v527_v49 = vpop.permute.xlu1 %526 }
 0x24f   : > { %v602_v46 = vpop.f32.mrb[0].mxu0 }
 0x250   : > { %v1656_v37 = vadd.f32 %v602_v46, %v522_v45  ;;  %v604_v47 = vpop.f32.mrb[1].mxu0 }
 0x251   : > { %v1658_v48 = vadd.f32 %v604_v47, %v522_v45 }
 0x253   : > { %v608_v50 = vpop.f32.mrb[2].mxu0  ;;  %v698_v51 = vadd.f32 %v1658_v48, %v1656_v37 }
 0x254   : > { %v1662_v52 = vadd.f32 %v608_v50, %v527_v49  ;;  %v610_v53 = vpop.f32.mrb[3].mxu0 }
 0x255   : > { %v1664_v54 = vadd.f32 %v610_v53, %v527_v49  ;;  %699 = vadd.xlane.f32.xlu1 %v698_v51 }
 0x257   : > { %v701_v55 = vadd.f32 %v1664_v54, %v1662_v52 }
 0x259   : > { %702 = vadd.xlane.f32.xlu0 %v701_v55  ;;  %710 = vadd.xlane.f32.xlu1 %v709_v14 }
 0x25d   : > { %707 = vadd.xlane.f32.xlu0 %v706_v43 }
 0x2e2   : > { %v700_v56 = vpop.xlane.xlu1 %699 }
 0x2e3   : > { %v704_v59 = vmul.f32 0.00390625, %v700_v56 }
 0x2e6   : > { %v703_v57 = vpop.xlane.xlu0 %702  ;;  %v711_v58 = vpop.xlane.xlu1 %710 }
 0x2e7   : > { %v705_v60 = vmul.f32 0.00390625, %v703_v57  ;;  %v713_v61 = vmul.f32 0.00390625, %v711_v58 }
 0x2e9   : > { %v714_v40 = vmax.f32 %v704_v59, %v705_v60 }
 0x2ea   : > { %v708_v62 = vpop.xlane.xlu0 %707 }
 0x2eb   : > { %v715_v63 = vrot.slane %v714_v40, 4  ;;  %v712_v0 = vmul.f32 0.00390625, %v708_v62 }
 0x2ed   : > { %v716_v1 = vmax.f32 %v714_v40, %v715_v63  ;;  %v721_v2 = vmax.f32 %v712_v0, %v713_v61 }
 0x2ef   : > { %v717_v3 = vrot.slane %v716_v1, 2  ;;  %v722_v4 = vrot.slane %v721_v2, 4 }
 0x2f1   : > { %v718_v5 = vmax.f32 %v716_v1, %v717_v3  ;;  %v723_v39 = vmax.f32 %v721_v2, %v722_v4 }
 0x2f3   : > { %v724_v7 = vrot.slane %v723_v39, 2  ;;  %v719_v6 = vrot.slane %v718_v5, 1 }
 0x2f5   : > { %v725_v9 = vmax.f32 %v723_v39, %v724_v7  ;;  %v720_v11 = vmax.f32 %v718_v5, %v719_v6 }
 0x2f7   : > { %v726_v10 = vrot.slane %v725_v9, 1 }
 0x2f9   : > { %v727_v12 = vmax.f32 %v725_v9, %v726_v10 }
 0x2fb   : > { %v728_v13 = vmax.f32 %v720_v11, %v727_v12 }
 0x2fd   : > { %v729_v15 = vsub.f32 %v704_v59, %v728_v13  ;;  %v730_v17 = vsub.f32 %v705_v60, %v728_v13  ;;  %v735_v18 = vsub.f32 %v712_v0, %v728_v13  ;;  %v736_v19 = vsub.f32 %v713_v61, %v728_v13 }
 0x2ff   : > { %v731_v20 = vmul.f32 1.442695, %v729_v15  ;;  %v733_v22 = vmul.f32 1.442695, %v730_v17  ;;  %v737_v42 = vmul.f32 1.442695, %v735_v18 }
 0x300   : > { %v739_v23 = vmul.f32 1.442695, %v736_v19 }
 0x301   : > { %1166 = vpow2.f32 %v731_v20 }
 0x302   : > { %1168 = vpow2.f32 %v733_v22 }
 0x303   : > { %1170 = vpow2.f32 %v737_v42 }
 0x304   : > { %1172 = vpow2.f32 %v739_v23 }
 0x30b   : > { %v1167_v24 = vpop.eup %1166 }
 0x30c   : > { %v1169_v25 = vpop.eup %1168 }
 0x30d   : > { %v1171_v16 = vpop.eup %1170  ;;  %v741_v26 = vadd.f32 %v1169_v25, %v1167_v24 }
 0x30e   : > { %v1173_v27 = vpop.eup %1172 }
 0x30f   : > { %v742_v28 = vrot.slane %v741_v26, 4  ;;  %v748_v29 = vadd.f32 %v1173_v27, %v1171_v16 }
 0x311   : > { %v743_v30 = vadd.f32 %v742_v28, %v741_v26  ;;  %v749_v31 = vrot.slane %v748_v29, 4 }
 0x313   : > { %v744_v32 = vrot.slane %v743_v30, 2  ;;  %v750_v21 = vadd.f32 %v749_v31, %v748_v29 }
 0x315   : > { %v745_v33 = vadd.f32 %v744_v32, %v743_v30  ;;  %v751_v34 = vrot.slane %v750_v21, 2 }
 0x317   : > { %v746_v35 = vrot.slane %v745_v33, 1  ;;  %v752_v36 = vadd.f32 %v751_v34, %v750_v21 }
 0x319   : > { %v747_v43 = vadd.f32 %v746_v35, %v745_v33  ;;  %v753_v14 = vrot.slane %v752_v36, 1 }
 0x31b   : > { %v754_v45 = vadd.f32 %v753_v14, %v752_v36 }
 0x31d   : > { %v755_v46 = vadd.f32 %v754_v45, %v747_v43 }
 0x31f   : > { %1174 = vrcp.f32 %v755_v46 }
 0x329   : > { %v1175_v47 = vpop.eup %1174 }
 0x32a   : > { %v757_v49 = vmul.f32 %v1175_v47, %v1167_v24  ;;  %v758_v50 = vmul.f32 %v1175_v47, %v1169_v25  ;;  %v759_v51 = vmul.f32 %v1175_v47, %v1171_v16  ;;  %v760_v53 = vmul.f32 %v1175_v47, %v1173_v27 }
 0x32c   : > { %v761_v55 = vmul.f32 %v757_v49, %v1656_v37  ;;  %v762_v56 = vmul.f32 %v757_v49, %v1658_v48  ;;  %v765_v57 = vmul.f32 %v759_v51, %v1644_v38  ;;  %v766_v58 = vmul.f32 %v759_v51, %v1646_v41 }
 0x32d   : > { %v763_v59 = vmul.f32 %v758_v50, %v1662_v52  ;;  %v764_v60 = vmul.f32 %v758_v50, %v1664_v54  ;;  %v767_v40 = vmul.f32 %v760_v53, %v1650_v44  ;;  %v768_v61 = vmul.f32 %v760_v53, %v1652_v8 }
 0x32e   : > { %v769_v62 = vadd.f32 %v765_v57, %v761_v55  ;;  %v770_v63 = vadd.f32 %v766_v58, %v762_v56 }
 0x32f   : > { %v771_v38 = vadd.f32 %v767_v40, %v763_v59  ;;  %v772_v41 = vadd.f32 %v768_v61, %v764_v60 }
 0x330   : > { %773 = vst [vmem:[%s230_s13] sm:$0xff] %v769_v62  ;;  %774 = vst [vmem:[%s230_s13 + $0x8] sm:$0xff] %v770_v63 }
 0x331   : > { %775 = vst [vmem:[%s230_s13 + $0x10] sm:$0xff] %v771_v38  ;;  %776 = vst [vmem:[%s230_s13 + $0x18] sm:$0xff] %v772_v41 }
 0x332   : > { %1247 = shalt.err (!%p1244_p7)
}
 0x333   : > { %s1248_s25 = scalar_lea.hbm %s1682_s28, 512  ;;  %s1252_s29 = scalar_lea.hbm %s1732_s4, 1024 }
 0x334   : > { %p1249_p9 = scmp.ne.s32.totalorder %s1682_s28, %s1248_s25  ;;  %p1253_p5 = scmp.lt.u32.totalorder %s1682_s28, %s1732_s4 }
 0x335   : > { %p1254_p11 = scmp.lt.u32.totalorder %s1252_s29, %s1248_s25  ;;  %p1256_p4 = scmp.lt.u32.totalorder %s1248_s25, %s1682_s28 }
 0x336   : > { %p1250_p1 = pnand %p1249_p9, %p1443_p12 }
 0x337   : > { %p1255_p2 = por %p1254_p11, %p1253_p5 }
 0x338   : > { %p1251_p0 = pneg %p1250_p1 }
 0x339   : > { %p1257_p6 = por %p1256_p4, %p1255_p2 }
 0x33b   : > { %p1258_p8 = pnand %p1257_p6, %p1251_p0 }
 0x33d   : > { %1261 = shalt.err (!%p1258_p8)
}
 0x33e   : > { %s1322_s12 = smov 256   ;;  %s1323_s13 = smov 16  }
 0x33f   : > { %978 = dma.vmem_to_hbm [thread:$0]  (%p1443_p12), %s1684_s9, 512, %s1682_s28, %s778_s10, %s1322_s12, %s1322_s12, %s1323_s13  }
 0x340 PF: > { %s806_s19 = sand.u32 1, %s1292_s15   ;;  %p1757_p10 = scmp.ne.s32.totalorder %s1737_s22, 0 }
 0x341   : > { %p1758_p13 = scmp.ge.s32.totalorder %s1304_s18, 2  ;;  %s807_s20 = scalar_lea.sflag [#allocation5], %s806_s19 }
 0x343   : > { %p989_p3 = pnand %p1758_p13, %p1757_p10 }
 0x345   : > { %1287 = dma.done.wait (!%p989_p3), %s807_s20, 512  }
 0x346   : > { %1289 = vsyncadd (!%p989_p3), %s807_s20, 4294966784  ;;  %p18_p7 = scmp.ge.s32.totalorder %s1405_s27, 4   ;;  %s1759_s15 = smov %s1296_s16 }
 0x347   : > { %s1760_s16 = smov %s1300_s17  ;;  %s1761_s17 = smov %s1439_s24 }
 0x348   : > { %s1762_s18 = smov %s1405_s27  ;;  %20 = sbr.rel (!%p18_p7) target bundleno = 6 (0x6), region = 85 }
 0x34f   :  { %812 = vsyncpa [#allocation4], 1 }
 0x350   :  { %814 = vsyncpa [#allocation4 + $0x1], 1 }
 0x351   :  { %815 = vsyncpa [#allocation7], 1 }
 0x352   :  { %816 = vsyncpa [#allocation5], 1 }
 0x353   :  { %818 = vsyncpa [#allocation5 + $0x1], 1 }

</bundles_post_ra>
